<compile_context>
chip_gen: v6e
topology: v6e:2x2x1
jax: 0.10.0
libtpu: 0.0.40
codegen_flags: <defaults>
</compile_context>

<pallas_src>
import functools

import jax
import jax.numpy as jnp
from jax.experimental import pallas as pl
from jax.experimental.pallas import tpu as pltpu


def _round_up(a, b):
    return (a + b - 1) // b * b


def _conv1d_relu_kernel(p_ref, w_ref, b_ref, o_ref):
    # p_ref: (C_in*K, L_tile)  bf16 patches tile (lane dim = output positions)
    # w_ref: (C_out, C_in*K)   bf16 flattened conv weight (VMEM-resident)
    # b_ref: (C_out, 1)        f32 bias (VMEM-resident)
    # o_ref: (C_out, L_tile)   f32 output tile, already in NCL layout (lane-dense)
    acc = jnp.dot(w_ref[...], p_ref[...], preferred_element_type=jnp.float32)
    acc = acc + b_ref[...]                       # broadcast bias over lanes (f32)
    o_ref[...] = jnp.maximum(acc, 0.0).astype(o_ref.dtype)


def _choose_l_tile(l_out, c_out):
    # ~2 MiB of f32 output per grid step, 128-lane aligned, clamped so
    # 2x(out tile + patch tile) stays far below v7x's 64 MiB VMEM.
    t = (2 * 1024 * 1024) // (4 * c_out)
    t = (t // 128) * 128
    t = max(128, min(t, 2048))
    return min(t, _round_up(l_out, 128))


@functools.partial(jax.jit, static_argnames=("stride",))
def encoder_forward(x, weight, bias, *, stride):
    """Conv1d + ReLU.

    x:      (N, C_in, L)        -- PyTorch NCL layout
    weight: (C_out, C_in, K)    -- PyTorch Conv1d weight layout
    bias:   (C_out,)
    returns (N, C_out, L_out), L_out = (L - K)//stride + 1
    """
    N, C_in, L = x.shape
    C_out, _, K = weight.shape
    L_out = (L - K) // stride + 1
    CK = C_in * K

    L_tile = _choose_l_tile(L_out, C_out)
    num_tiles = pl.cdiv(L_out, L_tile)
    L_out_pad = num_tiles * L_tile

    # --- glue (plain JAX, fuses into a single pass): strided-slice im2col ----
    # patches[n, c*K + k, t] = x[n, c, t*stride + k]
    cols = []
    for k in range(K):
        lim = k + (L_out - 1) * stride + 1
        cols.append(jax.lax.slice(x, (0, 0, k), (N, C_in, lim), (1, 1, stride)))
    patches = jnp.stack(cols, axis=2).reshape(N, CK, L_out)
    patches = jnp.pad(patches, ((0, 0), (0, 0), (0, L_out_pad - L_out)))
    patches = patches.astype(jnp.bfloat16)                 # halve streamed bytes

    w_flat = weight.reshape(C_out, CK).astype(jnp.bfloat16)    # (C_out, C_in*K)
    b2 = bias.reshape(C_out, 1).astype(jnp.float32)            # (C_out, 1)

    # --- hot path (Pallas): lane-dense matmul + bias + relu, output in NCL ---
    out = pl.pallas_call(
        _conv1d_relu_kernel,
        out_shape=jax.ShapeDtypeStruct((N, C_out, L_out), x.dtype),
        grid=(N, num_tiles),
        in_specs=[
            pl.BlockSpec((None, CK, L_tile), lambda n, j: (n, 0, j)),
            pl.BlockSpec((C_out, CK), lambda n, j: (0, 0)),
            pl.BlockSpec((C_out, 1), lambda n, j: (0, 0)),
        ],
        out_specs=pl.BlockSpec((None, C_out, L_tile), lambda n, j: (n, 0, j)),
        compiler_params=pltpu.CompilerParams(
            dimension_semantics=("parallel", "parallel"),
            vmem_limit_bytes=32 * 1024 * 1024,
        ),
    )(patches, w_flat, b2)
    return out


def _reference_forward(x, weight, bias, *, stride):
    # Pure-JAX reference (lax conv) for correctness check.
    out = jax.lax.conv_general_dilated(
        x, weight,
        window_strides=(stride,),
        padding="VALID",
        dimension_numbers=("NCH", "OIH", "NCH"),
    )
    return jnp.maximum(out + bias[None, :, None], 0.0)


if __name__ == "__main__":
    # Module hyper-parameters (small, consistent with the forward pass)
    input_size = 4      # C_in
    hidden_size = 32    # C_out
    kernel_size = 3
    stride = 2

    N, L = 2, 16        # batch, sequence length

    key = jax.random.PRNGKey(0)
    k_x, k_w, k_b = jax.random.split(key, 3)

    x = jax.random.normal(k_x, (N, input_size, L), dtype=jnp.float32)

    # Deterministic parameter init (uniform, PyTorch Conv1d-style fan-in bound)
    fan_in = input_size * kernel_size
    bound = 1.0 / jnp.sqrt(jnp.float32(fan_in))
    weight = jax.random.uniform(
        k_w, (hidden_size, input_size, kernel_size),
        minval=-bound, maxval=bound, dtype=jnp.float32)
    bias = jax.random.uniform(
        k_b, (hidden_size,), minval=-bound, maxval=bound, dtype=jnp.float32)

    out = encoder_forward(x, weight, bias, stride=stride)
    out = jax.block_until_ready(out)

    L_out = (L - kernel_size) // stride + 1
    assert out.shape == (N, hidden_size, L_out), out.shape

    # Reference with the same bf16 rounding of the streamed operands
    # (accumulation stays f32 on both paths), so tolerances stay tight.
    x_q = x.astype(jnp.bfloat16).astype(jnp.float32)
    w_q = weight.astype(jnp.bfloat16).astype(jnp.float32)
    ref = _reference_forward(x_q, w_q, bias, stride=stride)
    assert jnp.allclose(out, ref, atol=1e-4, rtol=1e-4), "mismatch vs reference conv"

    print("KERNEL_OK")
</pallas_src>

<mosaic_0001>
module attributes {stable_mosaic.version = 11 : i64} {
  func.func @_conv1d_relu_kernel(%arg0: i32, %arg1: i32, %arg2: memref<1x12x128xbf16, #tpu.memory_space<vmem>>, %arg3: memref<32x12xbf16, #tpu.memory_space<vmem>>, %arg4: memref<32x1xf32, #tpu.memory_space<vmem>>, %arg5: memref<1x32x128xf32, #tpu.memory_space<vmem>>) attributes {dimension_semantics = [#tpu.dimension_semantics<parallel>, #tpu.dimension_semantics<parallel>], iteration_bounds = array<i64: 2, 1>, scalar_prefetch = 0 : i64, scratch_operands = 0 : i64, tpu.core_type = #tpu.core_type<tc>, window_params = [{transform_indices = @transform_0, window_bounds = array<i64: 1, 12, 128>}, {pipeline_mode = #tpu.pipeline_mode<synchronous>, transform_indices = @transform_1, window_bounds = array<i64: 32, 12>}, {pipeline_mode = #tpu.pipeline_mode<synchronous>, transform_indices = @transform_2, window_bounds = array<i64: 32, 1>}, {transform_indices = @transform_3, window_bounds = array<i64: 1, 32, 128>}]} {
    %c0 = arith.constant 0 : index
    %c0_0 = arith.constant 0 : index
    %0 = vector.load %arg3[%c0, %c0_0] : memref<32x12xbf16, #tpu.memory_space<vmem>>, vector<32x12xbf16>
    %c0_1 = arith.constant 0 : index
    %c0_2 = arith.constant 0 : index
    %c0_3 = arith.constant 0 : index
    %1 = vector.load %arg2[%c0_1, %c0_2, %c0_3] : memref<1x12x128xbf16, #tpu.memory_space<vmem>>, vector<1x12x128xbf16>
    %2 = vector.shape_cast %1 : vector<1x12x128xbf16> to vector<12x128xbf16>
    %cst = arith.constant dense<0.000000e+00> : vector<32x128xf32>
    %3 = tpu.matmul %0, %2, %cst {dimension_numbers = #tpu.dot_dimension_numbers<[1], [0], [0], [1], [0, 0, 1, 1], [], []>} : vector<32x12xbf16>, vector<12x128xbf16>, vector<32x128xf32> -> vector<32x128xf32>
    %c0_4 = arith.constant 0 : index
    %c0_5 = arith.constant 0 : index
    %4 = vector.load %arg4[%c0_4, %c0_5] : memref<32x1xf32, #tpu.memory_space<vmem>>, vector<32x1xf32>
    %5 = vector.broadcast %4 : vector<32x1xf32> to vector<32x128xf32>
    %6 = arith.addf %3, %5 : vector<32x128xf32>
    %cst_6 = arith.constant 0.000000e+00 : f32
    %7 = vector.broadcast %cst_6 : f32 to vector<32x128xf32>
    %8 = arith.maximumf %6, %7 : vector<32x128xf32>
    %c0_7 = arith.constant 0 : index
    %c0_8 = arith.constant 0 : index
    %c0_9 = arith.constant 0 : index
    %9 = vector.load %arg5[%c0_7, %c0_8, %c0_9] : memref<1x32x128xf32, #tpu.memory_space<vmem>>, vector<1x32x128xf32>
    %10 = vector.shape_cast %9 : vector<1x32x128xf32> to vector<32x128xf32>
    %11 = vector.shape_cast %8 : vector<32x128xf32> to vector<1x32x128xf32>
    tpu.vector_store %arg5[%c0_7, %c0_8, %c0_9], %11 {strides = array<i32>} : memref<1x32x128xf32, #tpu.memory_space<vmem>>, vector<1x32x128xf32>,
    return
  }
  func.func @transform_0(%arg0: i32, %arg1: i32) -> (i32, i32, i32) {
    %c0_i32 = arith.constant 0 : i32
    %c0_i32_0 = arith.constant 0 : i32
    return %arg0, %c0_i32, %arg1 : i32, i32, i32
  }
  func.func @transform_1(%arg0: i32, %arg1: i32) -> (i32, i32) {
    %c0_i32 = arith.constant 0 : i32
    %c0_i32_0 = arith.constant 0 : i32
    %c0_i32_1 = arith.constant 0 : i32
    return %c0_i32, %c0_i32_0 : i32, i32
  }
  func.func @transform_2(%arg0: i32, %arg1: i32) -> (i32, i32) {
    %c0_i32 = arith.constant 0 : i32
    %c0_i32_0 = arith.constant 0 : i32
    %c0_i32_1 = arith.constant 0 : i32
    return %c0_i32, %c0_i32_0 : i32, i32
  }
  func.func @transform_3(%arg0: i32, %arg1: i32) -> (i32, i32, i32) {
    %c0_i32 = arith.constant 0 : i32
    %c0_i32_0 = arith.constant 0 : i32
    return %arg0, %c0_i32, %arg1 : i32, i32, i32
  }
}

</mosaic_0001>

<bundles_post_ra>
// kernel: encoder_forward.1
= control target key start
LH: loop header
LB: loop body
LE: loop exit
PB: predicated region body
PF: predicated region fallthrough
CT: control target
= control target key end

     0   :  { %s502_s12 = smov 0   ;;  %s504_s13 = smov 0   ;;  %s555_s0 = inlined_call_operand.vmem [shape: bf16[2,12,128], index: 0, kind: input, shape index: {}]   ;;  %s556_s1 = inlined_call_operand.vmem [shape: bf16[32,12], index: 1, kind: input, shape index: {}]   ;;  %s557_s2 = inlined_call_operand.vmem [shape: f32[32,1], index: 2, kind: input, shape index: {}]   ;;  %s558_s3 = inlined_call_operand.vmem [shape: f32[2,32,7], index: 3, kind: output, shape index: {}]  }
   0x1   :  { %s506_s14 = smov 0  }
   0x2 LB: > { %s25_s15 = sadd.s32 1, %s475_s13  ;;  %p403_p0 = scmp.ge.s32.totalorder %s479_s14, 1  ;;  %s479_s14 = sphi %s506_s14, %s13_s14   ;;  %s475_s13 = sphi %s504_s13, %s560_s13   ;;  %s471_s12 = sphi %s502_s12, %s559_s12  }
   0x3   : > { %p27_p1 = scmp.ge.s32.totalorder %s25_s15, 2  ;;  %p156_p2 = scmp.lt.s32.totalorder %s479_s14, 3 }
   0x5   : > { %s562_s15 = smov (%p27_p1, %s25_s15), 0  ;;  %p157_p3 = pnand %p403_p0, %p156_p2 }
   0x6   : > { %p186_p4 = scmp.lt.s32.totalorder (!%p157_p3), %s471_s12, 1 }
   0x7   : > { %160 = sbr.rel (%p157_p3) target bundleno = 224 (0xe0), region = 32 }
   0xc   : > { %v455_v0 = vld [vmem:[%s556_s1] sm:$0xff]   ;;  %vm248_vm0 = vcmask 97280   ;;  %s564_s12 = smov (!%p186_p4, %s471_s12), 1  ;;  %v211_v1 = vld [vmem:[%s557_s2 + $0x10] sm:$0xff]  ;;  %v481_v3 = vmov 0   ;;  %vm255_vm1 = vcmask 1045504  }
   0xd   : > { %v209_v2 = vld [vmem:[%s557_s2] sm:$0xff]  ;;  %422 = vmatprep.mubr.msk.bf16.mxu0 %vm248_vm0, %v455_v0  ;;  %453 = vset.pattern.permute.xlu1 %v481_v3  ;;  %s415_s22 = sshll.u32 %s564_s12, 3  ;;  %v212_v4 = vld [vmem:[%s557_s2 + $0x18] sm:$0xff]  ;;  %v210_v5 = vld [vmem:[%s557_s2 + $0x8] sm:$0xff]  ;;  %s416_s5 = sshll.u32 %s564_s12, 5 }
   0xe   : > { %452 = vset.pattern.permute.xlu0 %v481_v3  ;;  %225 = vperm.xlu1 %453, %v211_v1   ;;  %s193_s25 = scalar_lea.vmem %s555_s0, %s415_s22  ;;  %v456_v8 = vld [vmem:[%s556_s1 + $0x8] sm:$0xff]   ;;  %s201_s8 = scalar_lea.vmem %s558_s3, %s416_s5 }
   0xf   : > { %215 = vperm.xlu0 %452, %v209_v2   ;;  %v454_v6 = vld [vmem:[%s193_s25] sm:$0x3f]  }
  0x10   : > { %426 = vmatprep.subr.msk.bf16.mxu0 %vm255_vm1, %v454_v6  ;;  %v257_v7 = vsel %vm255_vm1, %v454_v6, 0 }
  0x11   : > { %421 = vmatpush3.bf16.msra.mxu0 %v257_v7 }
  0x12   : > { %230 = vperm.xlu1 %453, %v212_v4  }
  0x13   : > { %220 = vperm.xlu0 %452, %v210_v5  }
  0x14   : > { %423 = vmatmul.mubr.msk.bf16.vlgmr.msra.gmra.mxu0 %vm248_vm0, %v456_v8 }
  0x89   : > { %v226_v9 = vpop.permute.xlu1 %225 }
  0x8a   : > { %v216_v10 = vpop.permute.xlu0 %215 }
  0x8d   : > { %v231_v16 = vpop.permute.xlu1 %230 }
  0x8e   : > { %v221_v20 = vpop.permute.xlu0 %220 }
  0xd4   : > { %v424_v11 = vpop.f32.mrf.mxu0 }
  0xd5   : > { %v302_v12 = vadd.f32 %v424_v11, %v226_v9 }
  0xd6   : > { %v293_v13 = vpop.f32.mrf.mxu0 }
  0xd7   : > { %v310_v14 = vmax.f32 %v302_v12, 0.0  ;;  %v294_v15 = vadd.f32 %v293_v13, %v216_v10 }
  0xd8   : > { %v425_v17 = vpop.f32.mrf.mxu0 }
  0xd9   : > { %314 = vst [vmem:[%s201_s8 + $0x10] sm:$0xff] %v310_v14  ;;  %v308_v18 = vmax.f32 %v294_v15, 0.0  ;;  %v305_v19 = vadd.f32 %v425_v17, %v231_v16 }
  0xda   : > { %v296_v21 = vpop.f32.mrf.mxu0 }
  0xdb   : > { %312 = vst [vmem:[%s201_s8] sm:$0xff] %v308_v18  ;;  %v311_v22 = vmax.f32 %v305_v19, 0.0  ;;  %v297_v23 = vadd.f32 %v296_v21, %v221_v20 }
  0xdd   : > { %315 = vst [vmem:[%s201_s8 + $0x18] sm:$0xff] %v311_v22  ;;  %v309_v24 = vmax.f32 %v297_v23, 0.0 }
  0xdf   : > { %313 = vst [vmem:[%s201_s8 + $0x8] sm:$0xff] %v309_v24 }
  0xe0 PF: > { %s13_s14 = sadd.s32 1, %s479_s14   ;;  %s559_s12 = smov %s475_s13 }
  0xe1   : > { %p10_p5 = scmp.ge.s32.totalorder %s13_s14, 4   ;;  %s560_s13 = smov %s562_s15 }
  0xe3   :  { %12 = sbr.rel (!%p10_p5) target bundleno = 2 (0x2), region = 62 }

</bundles_post_ra>
